<compile_context>
chip_gen: v5e
topology: v5e:2x2
jax: 0.10.0
libtpu: 0.0.40
codegen_flags: <defaults>
</compile_context>

<pallas_src>
import functools
import math

import jax
import jax.numpy as jnp
from jax.experimental import pallas as pl
from jax.experimental.pallas import tpu as pltpu

_LANE = 128


def _deep_rbl_kernel(x_ref, wt_ref, b_ref, o_ref, *, weights_resident: bool):
    """One (batch_tile, layer) grid step of the masked-linear chain.

    The f32 output tile is VMEM-resident across the depth axis and doubles as
    the running activation, so no scratch buffer is needed.
    """
    layer = pl.program_id(1)

    @pl.when(layer == 0)
    def _():
        o_ref[...] = x_ref[...]

    if weights_resident:
        wt = wt_ref[layer]   # (Fp, Fp) bf16, all layers VMEM-resident
        b = b_ref[layer]     # (1, Fp)  f32
    else:
        wt = wt_ref[...]     # (Fp, Fp) bf16, streamed for this layer
        b = b_ref[...]       # (1, Fp)  f32

    lhs = o_ref[...].astype(wt.dtype)         # bf16 operand for the MXU
    o_ref[...] = jnp.dot(lhs, wt, preferred_element_type=jnp.float32) + b
    # act_fx defaults to nn.Identity() -> nothing to apply.


def deep_rbl_forward(x, weights_t, biases, *, batch_tile=768):
    """Pallas DeepRBL forward.

    x:         (B, F)          float32 activations (F <= Fp).
    weights_t: (depth, Fp, Fp) bf16, masked, transposed to (in, out), Fp % 128 == 0.
    biases:    (depth, 1, Fp)  float32.
    Returns (B, F) float32.
    """
    B, F = x.shape
    depth, Fp, _ = weights_t.shape

    if F != Fp:  # lane-pad the feature dim (weights/biases are pre-padded)
        x = jnp.pad(x, ((0, 0), (0, Fp - F)))

    # Batch tiling: >=2 tiles whenever B > 8 (v7x megacore), capped by the
    # roofline-driven batch_tile; ragged last block handled by the cdiv grid.
    if B <= 8:
        tb = B
    else:
        tb = max(8, min(batch_tile, 8 * pl.cdiv(B, 16)))
    nb = pl.cdiv(B, tb)

    # Hold all layer weights VMEM-resident when they fit a modest budget
    # (fetched once thanks to the constant index_map); otherwise stream them
    # one layer per grid step.
    w_bytes = depth * Fp * Fp * weights_t.dtype.itemsize
    resident = w_bytes <= 12 * 1024 * 1024

    if resident:
        w_spec = pl.BlockSpec((depth, Fp, Fp), lambda i, l: (0, 0, 0))
        b_spec = pl.BlockSpec((depth, 1, Fp), lambda i, l: (0, 0, 0))
        w_buf_bytes = 2 * w_bytes
    else:
        w_spec = pl.BlockSpec((pl.Squeezed(), Fp, Fp), lambda i, l: (l, 0, 0))
        b_spec = pl.BlockSpec((pl.Squeezed(), 1, Fp), lambda i, l: (l, 0, 0))
        w_buf_bytes = 2 * 2 * Fp * Fp * weights_t.dtype.itemsize

    vmem_needed = (2 * 2 * tb * Fp * 4          # x + out blocks, double buffered
                   + w_buf_bytes                # weight buffers
                   + 2 * depth * Fp * 4)        # biases
    vmem_limit = int(min(max(2 * vmem_needed, 32 << 20), 48 << 20))

    out = pl.pallas_call(
        functools.partial(_deep_rbl_kernel, weights_resident=resident),
        out_shape=jax.ShapeDtypeStruct((B, Fp), jnp.float32),
        grid_spec=pltpu.PrefetchScalarGridSpec(
            num_scalar_prefetch=0,
            grid=(nb, depth),
            in_specs=[
                pl.BlockSpec((tb, Fp), lambda i, l: (i, 0)),   # activations in
                w_spec,                                        # layer weights
                b_spec,                                        # layer biases
            ],
            out_specs=pl.BlockSpec((tb, Fp), lambda i, l: (i, 0)),
        ),
        compiler_params=pltpu.CompilerParams(
            dimension_semantics=("parallel", "arbitrary"),
            vmem_limit_bytes=vmem_limit,
        ),
    )(x, weights_t, biases)

    return out if F == Fp else out[:, :F]


def _rbm_band_mask(features: int, ood_width: int) -> jax.Array:
    """_rbm_mask_generator with dens=1.0, rand_diag=False: |i - j| <= ood_width."""
    idx = jnp.arange(features)
    return (jnp.abs(idx[:, None] - idx[None, :]) <= ood_width).astype(jnp.float32)


def make_deep_rbl_params(key, features: int, depth: int, ood_width: int):
    """Masked RBLinear parameters (mirrors RBLinear.__init__ semantics), f32."""
    mask = _rbm_band_mask(features, ood_width)
    kw, kb = jax.random.split(key)
    bound = 1.0 / math.sqrt(features)
    w = jax.random.uniform(kw, (depth, features, features), jnp.float32,
                           minval=-bound, maxval=bound)
    b = jax.random.uniform(kb, (depth, features), jnp.float32,
                           minval=-bound, maxval=bound)
    # RBLinear: weight *= w_mask; bias mask is all-ones for rand_bias=False.
    return w * mask[None], b


def pack_deep_rbl_params(w_masked, biases):
    """One-time prep: lane-pad F to a multiple of 128, transpose to (in, out), cast to bf16."""
    depth, F, _ = w_masked.shape
    Fp = _LANE * pl.cdiv(F, _LANE)
    if Fp != F:
        w_masked = jnp.pad(w_masked, ((0, 0), (0, Fp - F), (0, Fp - F)))
        biases = jnp.pad(biases, ((0, 0), (0, Fp - F)))
    wt = jnp.transpose(w_masked, (0, 2, 1)).astype(jnp.bfloat16)
    return wt, biases.reshape(depth, 1, Fp).astype(jnp.float32)


def precompose_deep_rbl(w_masked, biases):
    """Identity-activation fast path: collapse the whole chain into one affine map."""
    w_tot, b_tot = w_masked[0], biases[0]
    for l in range(1, w_masked.shape[0]):
        w_tot = w_masked[l] @ w_tot
        b_tot = w_masked[l] @ b_tot + biases[l]
    return w_tot[None], b_tot[None]


if __name__ == "__main__":
    key = jax.random.PRNGKey(0)
    kx, kp = jax.random.split(key)

    batch, features, depth, ood_width = 16, 32, 3, 2
    x = jax.random.normal(kx, (batch, features), dtype=jnp.float32)
    w_masked, b = make_deep_rbl_params(kp, features, depth, ood_width)

    # Pure-JAX reference of DeepRBL.forward (Identity activations, no batchnorm).
    h = x
    for l in range(depth):
        h = h @ w_masked[l].T + b[l]

    # Layered kernel (general path).
    wt, b3 = pack_deep_rbl_params(w_masked, b)
    y = jax.block_until_ready(jax.jit(deep_rbl_forward)(x, wt, b3))
    assert y.shape == (batch, features)
    assert y.dtype == jnp.float32
    assert bool(jnp.allclose(y, h, rtol=2e-2, atol=2e-2)), float(jnp.max(jnp.abs(y - h)))

    # Module-default fast path: Identity activations => one pre-composed matmul.
    wt1, b1 = pack_deep_rbl_params(*precompose_deep_rbl(w_masked, b))
    y1 = jax.block_until_ready(jax.jit(deep_rbl_forward)(x, wt1, b1))
    assert bool(jnp.allclose(y1, h, rtol=2e-2, atol=2e-2)), float(jnp.max(jnp.abs(y1 - h)))

    print("KERNEL_OK")
</pallas_src>

<mosaic_0001>
module attributes {stable_mosaic.version = 11 : i64} {
  func.func @_deep_rbl_kernel(%arg0: i32, %arg1: i32, %arg2: memref<8x128xf32, #tpu.memory_space<vmem>>, %arg3: memref<3x128x128xbf16, #tpu.memory_space<vmem>>, %arg4: memref<3x1x128xf32, #tpu.memory_space<vmem>>, %arg5: memref<8x128xf32, #tpu.memory_space<vmem>>) attributes {dimension_semantics = [#tpu.dimension_semantics<parallel>, #tpu.dimension_semantics<arbitrary>], iteration_bounds = array<i64: 2, 3>, scalar_prefetch = 0 : i64, scratch_operands = 0 : i64, tpu.core_type = #tpu.core_type<tc>, window_params = [{transform_indices = @transform_0, window_bounds = array<i64: 8, 128>}, {pipeline_mode = #tpu.pipeline_mode<synchronous>, transform_indices = @transform_1, window_bounds = array<i64: 3, 128, 128>}, {pipeline_mode = #tpu.pipeline_mode<synchronous>, transform_indices = @transform_2, window_bounds = array<i64: 3, 1, 128>}, {transform_indices = @transform_3, window_bounds = array<i64: 8, 128>}]} {
    %c0_i32 = arith.constant 0 : i32
    %0 = arith.cmpi eq, %arg1, %c0_i32 : i32
    %1 = arith.extui %0 : i1 to i32
    %c0_i32_0 = arith.constant 0 : i32
    %2 = arith.cmpi ne, %1, %c0_i32_0 : i32
    scf.if %2 {
      %c0_8 = arith.constant 0 : index
      %c0_9 = arith.constant 0 : index
      %15 = vector.load %arg2[%c0_8, %c0_9] : memref<8x128xf32, #tpu.memory_space<vmem>>, vector<8x128xf32>
      %c0_10 = arith.constant 0 : index
      %c0_11 = arith.constant 0 : index
      %16 = vector.load %arg5[%c0_10, %c0_11] : memref<8x128xf32, #tpu.memory_space<vmem>>, vector<8x128xf32>
      tpu.vector_store %arg5[%c0_10, %c0_11], %15 {strides = array<i32>} : memref<8x128xf32, #tpu.memory_space<vmem>>, vector<8x128xf32>,
    } else {
    }
    %3 = arith.index_cast %arg1 : i32 to index
    %c0 = arith.constant 0 : index
    %c0_1 = arith.constant 0 : index
    %4 = vector.load %arg3[%3, %c0, %c0_1] : memref<3x128x128xbf16, #tpu.memory_space<vmem>>, vector<1x128x128xbf16>
    %5 = vector.shape_cast %4 : vector<1x128x128xbf16> to vector<128x128xbf16>
    %6 = arith.index_cast %arg1 : i32 to index
    %c0_2 = arith.constant 0 : index
    %c0_3 = arith.constant 0 : index
    %7 = vector.load %arg4[%6, %c0_2, %c0_3] : memref<3x1x128xf32, #tpu.memory_space<vmem>>, vector<1x1x128xf32>
    %8 = vector.shape_cast %7 : vector<1x1x128xf32> to vector<1x128xf32>
    %c0_4 = arith.constant 0 : index
    %c0_5 = arith.constant 0 : index
    %9 = vector.load %arg5[%c0_4, %c0_5] : memref<8x128xf32, #tpu.memory_space<vmem>>, vector<8x128xf32>
    %10 = arith.truncf %9 : vector<8x128xf32> to vector<8x128xbf16>
    %cst = arith.constant dense<0.000000e+00> : vector<8x128xf32>
    %11 = tpu.matmul %10, %5, %cst {dimension_numbers = #tpu.dot_dimension_numbers<[1], [0], [0], [1], [0, 0, 1, 1], [], []>} : vector<8x128xbf16>, vector<128x128xbf16>, vector<8x128xf32> -> vector<8x128xf32>
    %12 = vector.broadcast %8 : vector<1x128xf32> to vector<8x128xf32>
    %13 = arith.addf %11, %12 : vector<8x128xf32>
    %c0_6 = arith.constant 0 : index
    %c0_7 = arith.constant 0 : index
    %14 = vector.load %arg5[%c0_6, %c0_7] : memref<8x128xf32, #tpu.memory_space<vmem>>, vector<8x128xf32>
    tpu.vector_store %arg5[%c0_6, %c0_7], %13 {strides = array<i32>} : memref<8x128xf32, #tpu.memory_space<vmem>>, vector<8x128xf32>,
    return
  }
  func.func @transform_0(%arg0: i32, %arg1: i32) -> (i32, i32) {
    %c0_i32 = arith.constant 0 : i32
    %c0_i32_0 = arith.constant 0 : i32
    return %arg0, %c0_i32 : i32, i32
  }
  func.func @transform_1(%arg0: i32, %arg1: i32) -> (i32, i32, i32) {
    %c0_i32 = arith.constant 0 : i32
    %c0_i32_0 = arith.constant 0 : i32
    %c0_i32_1 = arith.constant 0 : i32
    %c0_i32_2 = arith.constant 0 : i32
    return %c0_i32, %c0_i32_0, %c0_i32_1 : i32, i32, i32
  }
  func.func @transform_2(%arg0: i32, %arg1: i32) -> (i32, i32, i32) {
    %c0_i32 = arith.constant 0 : i32
    %c0_i32_0 = arith.constant 0 : i32
    %c0_i32_1 = arith.constant 0 : i32
    %c0_i32_2 = arith.constant 0 : i32
    return %c0_i32, %c0_i32_0, %c0_i32_1 : i32, i32, i32
  }
  func.func @transform_3(%arg0: i32, %arg1: i32) -> (i32, i32) {
    %c0_i32 = arith.constant 0 : i32
    %c0_i32_0 = arith.constant 0 : i32
    return %arg0, %c0_i32 : i32, i32
  }
}

</mosaic_0001>

<bundles_post_ra>
// kernel: deep_rbl_forward.1
= control target key start
LH: loop header
LB: loop body
LE: loop exit
PB: predicated region body
PF: predicated region fallthrough
CT: control target
= control target key end

     0   :  { %8 = vsyncpa [#allocation3], 0  ;;  %s829_s0 = inlined_call_operand.vmem [shape: f32[16,128], index: 0, kind: input, shape index: {}]   ;;  %s830_s1 = inlined_call_operand.hbm [shape: bf16[3,128,128], index: 1, kind: input, shape index: {}]   ;;  %s831_s2 = inlined_call_operand.vmem [shape: f32[3,1,128], index: 2, kind: input, shape index: {}]   ;;  %s832_s3 = inlined_call_operand.hbm [shape: f32[16,128], index: 3, kind: output, shape index: {}]  }
   0x1   :  { %9 = vsyncpa [#allocation4], 0 }
   0x2   :  { %11 = vsyncpa [#allocation4 + $0x1], 0  ;;  %s685_s12 = smov 0   ;;  %s687_s13 = smov 0  }
   0x3   :  { %s689_s14 = smov 0   ;;  %s691_s15 = smov 0  }
   0x4   :  { %s693_s16 = smov 0   ;;  %s695_s17 = smov 0  }
   0x5   :  { %s697_s18 = smov 0   ;;  %s699_s19 = smov 0  }
   0x6 LB: > { %s390_s20 = sadd.s32 4294967295, %s660_s19   ;;  %s391_s21 = sadd.s32 4294967294, %s660_s19   ;;  %s660_s19 = sphi %s699_s19, %s17_s19   ;;  %s656_s18 = sphi %s697_s18, %s842_s18   ;;  %s652_s17 = sphi %s695_s17, %s841_s17   ;;  %s648_s16 = sphi %s693_s16, %s840_s16   ;;  %s644_s15 = sphi %s691_s15, %s839_s15   ;;  %s640_s14 = sphi %s689_s14, %s838_s14   ;;  %s636_s13 = sphi %s687_s13, %s837_s13   ;;  %s632_s12 = sphi %s685_s12, %s836_s12  }
   0x7   : > { %s26_s22 = sadd.s32 1, %s652_s17  ;;  %s29_s23 = sadd.s32 1, %s656_s18 }
   0x8   : > { %p27_p0 = scmp.ge.s32.totalorder %s26_s22, 3  ;;  %s104_s24 = sadd.s32 1, %s640_s14 }
   0x9   : > { %p114_p1 = scmp.ne.s32.totalorder %s640_s14, %s636_s13  ;;  %p115_p2 = scmp.eq.s32.totalorder %s390_s20, 5 }
   0xa   : > { %s844_s22 = smov (%p27_p0, %s26_s22), 0  ;;  %s846_s23 = smov (!%p27_p0, %s29_s23), %s656_s18 }
   0xb   : > { %p735_p3 = por %p115_p2, %p114_p1  ;;  %p120_p4 = scmp.ne.s32.totalorder %s636_s13, %s632_s12 }
   0xc   : > { %p31_p5 = scmp.ge.s32.totalorder %s846_s23, 2  ;;  %p121_p6 = scmp.eq.s32.totalorder %s391_s21, 5 }
   0xd   : > { %p392_p7 = scmp.ge.s32.totalorder %s660_s19, 1  ;;  %p128_p8 = scmp.lt.s32.totalorder %s660_s19, 7 }
   0xe   : > { %s848_s23 = smov (%p31_p5, %s846_s23), 0  ;;  %p745_p9 = por %p121_p6, %p120_p4 }
   0xf   : > { %p749_p10 = pnand %p392_p7, %p128_p8  ;;  %s101_s28 = ssub.s32 %s656_s18, %s848_s23 }
  0x10   : > { %p102_p11 = scmp.eq.s32.totalorder %s101_s28, 0  ;;  %p461_p13 = scmp.eq.s32.totalorder %s390_s20, 0 }
  0x11   : > { %p453_p12 = pneg %p749_p10  ;;  %s139_s4 = sshll.u32 %s830_s1, 4  ;;  %s140_s4 = int_to_ptr.hbm [resolvable:$true] %s139_s4 }
  0x12   : > { %s761_s5 = scalar_select %p102_p11, %s640_s14, %s104_s24  }
  0x13   : > { %s662_s6 = smov [#allocation2]   ;;  %p454_p0 = pnand %p461_p13, %p453_p12 }
  0x14   : > { %s141_s7 = sshll.u32 %s662_s6, 4  ;;  %s663_s8 = smov 64   ;;  %s142_s7 = int_to_ptr.vmem [resolvable:$true] %s141_s7 }
  0x15   : > { %s664_s9 = smov 4   ;;  %167 = sbr.rel (%p749_p10) target bundleno = 205 (0xcd), region = 32 }
  0x16   : > { %456 = dma.hbm_to_vmem [thread:$0]  (!%p454_p0), %s140_s4, 3072, %s142_s7, [#allocation3], %s663_s8, %s663_s8, %s664_s9  }
  0x1a   : > { %623 = dma.done.wait (%p461_p13), [#allocation3], 3072  }
  0x1b   : > { %625 = vsyncadd (%p461_p13), [#allocation3], 4294964224  ;;  %s188_s10 = sand.u32 1, %s636_s13   ;;  %p191_p1 = scmp.lt.s32.totalorder %s648_s16, 1 }
  0x1c   : > { %s397_s11 = sshll.u32 %s188_s10, 3  ;;  %p399_p2 = scmp.ne.s32.totalorder %s644_s15, 0 }
  0x1d   : > { %s192_s20 = scalar_select %p191_p1, %s648_s16, 1 }
  0x1e   : > { %s773_s30 = scalar_lea.vmem [#allocation5], %s397_s11  ;;  %198 = sbr.rel (%p399_p2) target bundleno = 37 (0x25), region = 40 }
  0x1f   : > { %s398_s21 = sshll.u32 %s192_s20, 3 }
  0x20   : > { %s194_s29 = scalar_lea.vmem %s829_s0, %s398_s21 }
  0x23   : > { %v199_v0 = vld [vmem:[%s194_s29] sm:$0xff] }
  0x24   : > { %200 = vst [vmem:[%s773_s30] sm:$0xff] %v199_v0 }
  0x25 PF: > { %s438_s27 = sshll.u32 %s644_s15, 6  ;;  %s220_s7 = scalar_lea.vmem %s831_s2, %s644_s15 }
  0x26   : > { %s203_s8 = scalar_lea.vmem [#allocation2], %s438_s27  ;;  %s435_s15 = sshll.u32 %s648_s16, 3  ;;  %v531_v11 = vld [vmem:[%s220_s7] ss:$0 sm:$0xff] }
  0x27   : > { %v446_v1 = vld [vmem:[%s203_s8 + $0x38] sm:$0xff]  ;;  %v445_v2 = vld [vmem:[%s203_s8 + $0x30] sm:$0xff]  ;;  %v444_v3 = vld [vmem:[%s203_s8 + $0x28] sm:$0xff]  ;;  %s300_s20 = scalar_lea.hbm %s832_s3, %s435_s15  ;;  %s302_s21 = sshll.u32 %s773_s30, 4  ;;  %s303_s21 = int_to_ptr.vmem [resolvable:$true] %s302_s21 }
  0x28   : > { %275 = vmatpush.bf16.msra.mxu0 %v446_v1  ;;  %v443_v4 = vld [vmem:[%s203_s8 + $0x20] sm:$0xff]  ;;  %v442_v5 = vld [vmem:[%s203_s8 + $0x18] sm:$0xff]  ;;  %v441_v6 = vld [vmem:[%s203_s8 + $0x10] sm:$0xff]  ;;  %s304_s24 = sshll.u32 %s300_s20, 4  ;;  %s290_s28 = scalar_lea.sflag [#allocation4], %s188_s10  ;;  %s305_s24 = int_to_ptr.hbm [resolvable:$true] %s304_s24 }
  0x29   : > { %v440_v7 = vld [vmem:[%s203_s8 + $0x8] sm:$0xff]  ;;  %v439_v8 = vld [vmem:[%s203_s8] sm:$0xff]  ;;  %s576_s29 = sshra.s32 %s305_s24, 4  ;;  %s582_s6 = scalar_lea.hbm %s832_s3, 16  ;;  %s577_s29 = int_to_ptr.hbm [resolvable:$true] %s576_s29 }
  0x2a   : > { %s578_s27 = scalar_lea.hbm %s577_s29, 8  ;;  %p583_p7 = scmp.lt.s32.totalorder %s577_s29, %s832_s3 }
  0x2b   : > { %v222_v9 = vld [vmem:[%s773_s30] sm:$0xff]  ;;  %p579_p4 = scmp.ne.s32.totalorder %s577_s29, %s578_s27  ;;  %p584_p8 = scmp.lt.s32.totalorder %s582_s6, %s578_s27 }
  0x2c   : > { %276 = vmatpush.bf16.msra.mxu0 %v445_v2  ;;  %v223_v10 = vpack.c.bf16 %v222_v9, %v222_v9 }
  0x2d   : > { %p580_p5 = pnand %p579_p4, %p735_p3  ;;  %p585_p10 = por %p584_p8, %p583_p7 }
  0x2f   : > { %p581_p6 = pneg %p580_p5 }
  0x30   : > { %277 = vmatpush.bf16.msra.mxu0 %v444_v3 }
  0x31   : > { %p586_p11 = pnand %p585_p10, %p581_p6 }
  0x34   : > { %278 = vmatpush.bf16.msra.mxu0 %v443_v4 }
  0x38   : > { %279 = vmatpush.bf16.msra.mxu0 %v442_v5 }
  0x3c   : > { %280 = vmatpush.bf16.msra.mxu0 %v441_v6 }
  0x40   : > { %281 = vmatpush.bf16.msra.mxu0 %v440_v7 }
  0x44   : > { %282 = vmatpush.bf16.msra.mxu0 %v439_v8 }
  0x47   : > { %283 = vmatmul.bf16.vlgmr.msra.gmra.mxu0 %v223_v10 }
  0xc4   : > { %v284_v12 = vpop.f32.mrf.mxu0 }
  0xc5   : > { %v285_v13 = vadd.f32 %v531_v11, %v284_v12 }
  0xc7   : > { %288 = vst [vmem:[%s773_s30] sm:$0xff] %v285_v13 }
  0xc8   : > { %589 = shalt.err (!%p586_p11)
}
  0xc9   : > { %451 = dma.vmem_to_hbm [thread:$0]  (%p735_p3), %s303_s21, 128, %s305_s24, %s290_s28  }
  0xcc   : > { %v286_v14 = vpop.f32.mrf.mxu0 }
  0xcd PF: > { %p463_p12 = scmp.ge.s32.totalorder %s660_s19, 2  ;;  %s316_s10 = sand.u32 1, %s632_s12  }
  0xce   : > { %s317_s30 = scalar_lea.sflag [#allocation4], %s316_s10 }
  0xcf   : > { %p458_p13 = pnand %p463_p12, %p745_p9 }
  0xd1   : > { %p459_p0 = pneg %p458_p13 }
  0xd3   : > { %627 = dma.done.wait (%p459_p0), %s317_s30, 128  }
  0xd4   : > { %629 = vsyncadd (%p459_p0), %s317_s30, 4294967168  ;;  %s17_s19 = sadd.s32 1, %s660_s19   ;;  %s836_s12 = smov %s636_s13 }
  0xd5   : > { %p14_p1 = scmp.ge.s32.totalorder %s17_s19, 8   ;;  %s837_s13 = smov %s640_s14 }
  0xd6   : > { %s838_s14 = smov %s761_s5  ;;  %s839_s15 = smov %s652_s17 }
  0xd7   : > { %s840_s16 = smov %s656_s18  ;;  %s841_s17 = smov %s844_s22 }
  0xd8   : > { %s842_s18 = smov %s848_s23  ;;  %16 = sbr.rel (!%p14_p1) target bundleno = 6 (0x6), region = 78 }
  0xdd   :  { %323 = vsyncpa [#allocation3], 1 }
  0xde   :  { %325 = vsyncpa [#allocation3 + $0x1], 1 }
  0xdf   :  { %326 = vsyncpa [#allocation4], 1 }
  0xe0   :  { %328 = vsyncpa [#allocation4 + $0x1], 1 }

</bundles_post_ra>
